<compile_context>
chip_gen: v7x
topology: tpu7x:2x2x1
jax: 0.10.0
libtpu: 0.0.40
codegen_flags: <defaults>
</compile_context>

<pallas_src>
import jax
import jax.numpy as jnp
from jax.experimental import pallas as pl
from jax.experimental.pallas import tpu as pltpu

EMB_DIM = 300
HID_DIM = 500
OUT_DIM = 4
LANE = 128


def _round_up(x, m):
    return ((x + m - 1) // m) * m


def mlp_kernel(ids_ref, emb_ref, w2_ref, b2_ref, w3_ref, b3_ref, out_ref):
    """One batch tile: embedding-bag + 2-layer MLP + sigmoid, all in VMEM.

    ids_ref : [TB, S]        int32 token ids
    emb_ref : [V_PAD, D_PAD] bf16 embedding table (padding rows are zero)
    w2_ref  : [D_PAD, H_PAD] bf16   b2_ref: [1, H_PAD] f32
    w3_ref  : [H_PAD, O_PAD] bf16   b3_ref: [1, O_PAD] f32
    out_ref : [TB, O_PAD]    f32 (lane-dense; sliced to 4 cols in the wrapper)
    """
    tb, s_len = ids_ref.shape
    v_pad = emb_ref.shape[0]

    ids = ids_ref[...]                                            # [TB, S]
    vocab_lanes = jax.lax.broadcasted_iota(jnp.int32, (1, v_pad), 1)

    # Streamed embedding-bag: counts[b, v] = #occurrences of token v in row b.
    # One compare + add per position on a single [TB, V_PAD] f32 tile; no
    # [TB, S, V] intermediate.  S is a trace-time constant -> static loop.
    counts = jnp.zeros((tb, v_pad), jnp.float32)
    for s in range(s_len):
        counts = counts + (ids[:, s:s + 1] == vocab_lanes).astype(jnp.float32)

    # torch.mean(dim=1): fold the 1/S scale into the (cheap) counts cast.
    # The padding row of emb is zero, so padding tokens contribute nothing
    # (matches nn.Embedding padding_idx semantics under the mean).
    counts = (counts * (1.0 / s_len)).astype(jnp.bfloat16)        # [TB, V]

    pooled = jnp.dot(counts, emb_ref[...],
                     preferred_element_type=jnp.float32)          # [TB, D]
    h = jnp.maximum(pooled, 0.0)                                  # relu

    h = jnp.dot(h.astype(jnp.bfloat16), w2_ref[...],
                preferred_element_type=jnp.float32) + b2_ref[...]  # [TB, H]
    h = jnp.maximum(h, 0.0)                                        # relu

    h = jnp.dot(h.astype(jnp.bfloat16), w3_ref[...],
                preferred_element_type=jnp.float32) + b3_ref[...]  # [TB, O]
    out_ref[...] = jax.nn.sigmoid(h)                               # sigmoid


def _pick_batch_tile(B):
    """Batch-tile rows: multiple of 16 (bf16 sublane tiling), >=2 tiles for
    medium batches (keeps both v7x TensorCores busy), 256 for big batches."""
    if B <= 16:
        return 16
    if B <= 512:
        return _round_up((B + 1) // 2, 16)
    return 256


def mlp_classifier_forward(xb, kernel_params):
    """Forward pass equivalent to mlp_classifier.forward.

    xb: [B, S] int32 token ids.  Returns [B, 4] f32 sigmoid probabilities.
    """
    emb_p, w2_p, b2_p, w3_p, b3_p = kernel_params
    B, S = xb.shape
    v_pad, d_pad = emb_p.shape
    h_pad = w2_p.shape[1]
    o_pad = w3_p.shape[1]

    TB = _pick_batch_tile(B)
    B_pad = _round_up(B, TB)
    ids = xb.astype(jnp.int32)
    if B_pad != B:
        ids = jnp.pad(ids, ((0, B_pad - B), (0, 0)))  # extra rows sliced off

    grid = (B_pad // TB,)
    resident2d = lambda i: (0, 0)   # weights: constant block across the grid

    out = pl.pallas_call(
        mlp_kernel,
        out_shape=jax.ShapeDtypeStruct((B_pad, o_pad), jnp.float32),
        grid_spec=pltpu.PrefetchScalarGridSpec(
            num_scalar_prefetch=0,
            grid=grid,
            in_specs=[
                pl.BlockSpec((TB, S), lambda i: (i, 0)),       # token ids
                pl.BlockSpec((v_pad, d_pad), resident2d),      # emb table
                pl.BlockSpec((d_pad, h_pad), resident2d),      # w2
                pl.BlockSpec((1, h_pad), resident2d),          # b2
                pl.BlockSpec((h_pad, o_pad), resident2d),      # w3
                pl.BlockSpec((1, o_pad), resident2d),          # b3
            ],
            out_specs=pl.BlockSpec((TB, o_pad), lambda i: (i, 0)),
        ),
        compiler_params=pltpu.CompilerParams(
            dimension_semantics=("parallel",),
            # Per-step footprint is ~2-3 MiB (streamed counts + resident
            # weights), so 32 MiB is ample headroom on every generation and
            # safely under v7x's 64 MiB physical VMEM.
            vmem_limit_bytes=32 * 1024 * 1024,
        ),
    )(ids, emb_p, w2_p, b2_p, w3_p, b3_p)

    return out[:B, :OUT_DIM]


def init_params(key, vocab_len):
    """Unpadded f32 params with PyTorch-equivalent shapes ([in, out] layout)."""
    k_emb, k_w2, k_b2, k_w3, k_b3 = jax.random.split(key, 5)

    # nn.Embedding(vocab_len + 1, 300, padding_idx=vocab_len)
    emb = jax.random.normal(k_emb, (vocab_len + 1, EMB_DIM), jnp.float32)
    emb = emb.at[vocab_len].set(0.0)  # padding row zeroed

    lim2 = 1.0 / (EMB_DIM ** 0.5)
    w2 = jax.random.uniform(k_w2, (EMB_DIM, HID_DIM), jnp.float32, -lim2, lim2)
    b2 = jax.random.uniform(k_b2, (1, HID_DIM), jnp.float32, -lim2, lim2)

    lim3 = 1.0 / (HID_DIM ** 0.5)
    w3 = jax.random.uniform(k_w3, (HID_DIM, OUT_DIM), jnp.float32, -lim3, lim3)
    b3 = jax.random.uniform(k_b3, (1, OUT_DIM), jnp.float32, -lim3, lim3)

    return emb, w2, b2, w3, b3


def prepare_params(emb, w2, b2, w3, b3):
    """Zero-pad to lane-dense dims and cast weights to bf16 for the kernel."""
    V, D = emb.shape
    H = w2.shape[1]
    O = w3.shape[1]
    v_pad = _round_up(V, LANE)       # 51  -> 128
    d_pad = _round_up(D, LANE)       # 300 -> 384
    h_pad = _round_up(H, LANE)       # 500 -> 512
    o_pad = _round_up(O, LANE)       # 4   -> 128 (lane-dense output slab)

    emb_p = jnp.zeros((v_pad, d_pad), jnp.float32).at[:V, :D].set(emb)
    w2_p = jnp.zeros((d_pad, h_pad), jnp.float32).at[:D, :H].set(w2)
    b2_p = jnp.zeros((1, h_pad), jnp.float32).at[:, :H].set(b2)
    w3_p = jnp.zeros((h_pad, o_pad), jnp.float32).at[:H, :O].set(w3)
    b3_p = jnp.zeros((1, o_pad), jnp.float32).at[:, :O].set(b3)

    return (emb_p.astype(jnp.bfloat16), w2_p.astype(jnp.bfloat16), b2_p,
            w3_p.astype(jnp.bfloat16), b3_p)


if __name__ == "__main__":
    key = jax.random.PRNGKey(0)
    vocab_len = 50
    batch, seq = 2, 8

    k_params, k_tokens = jax.random.split(key)
    emb_f, w2_f, b2_f, w3_f, b3_f = init_params(k_params, vocab_len)
    kernel_params = prepare_params(emb_f, w2_f, b2_f, w3_f, b3_f)

    # Token ids in [0, vocab_len]; index vocab_len is the padding token.
    xb = jax.random.randint(k_tokens, (batch, seq), 0, vocab_len + 1, jnp.int32)

    out = mlp_classifier_forward(xb, kernel_params)
    out = jax.block_until_ready(out)
    assert out.shape == (batch, OUT_DIM)

    # Reference 1: bf16-matched precision path (tight tolerance).
    embb = emb_f.astype(jnp.bfloat16).astype(jnp.float32)
    w2b = w2_f.astype(jnp.bfloat16).astype(jnp.float32)
    w3b = w3_f.astype(jnp.bfloat16).astype(jnp.float32)
    p = jnp.maximum(jnp.mean(embb[xb], axis=1), 0.0)
    p = jnp.maximum(p.astype(jnp.bfloat16).astype(jnp.float32) @ w2b + b2_f, 0.0)
    ref_bf16 = jax.nn.sigmoid(
        p.astype(jnp.bfloat16).astype(jnp.float32) @ w3b + b3_f)
    assert jnp.allclose(out, ref_bf16, atol=5e-3), "mismatch vs bf16 reference"

    # Reference 2: exact PyTorch (f32) semantics (loose tolerance for bf16).
    h_ref = jnp.maximum(jnp.mean(emb_f[xb], axis=1), 0.0)
    h_ref = jnp.maximum(h_ref @ w2_f + b2_f, 0.0)
    ref_f32 = jax.nn.sigmoid(h_ref @ w3_f + b3_f)
    assert jnp.allclose(out, ref_f32, atol=2e-2), "mismatch vs f32 reference"

    print("KERNEL_OK")
</pallas_src>

<mosaic_0001>
module attributes {stable_mosaic.version = 11 : i64} {
  func.func @mlp_kernel(%arg0: i32, %arg1: memref<16x8xi32, #tpu.memory_space<vmem>>, %arg2: memref<128x384xbf16, #tpu.memory_space<vmem>>, %arg3: memref<384x512xbf16, #tpu.memory_space<vmem>>, %arg4: memref<1x512xf32, #tpu.memory_space<vmem>>, %arg5: memref<512x128xbf16, #tpu.memory_space<vmem>>, %arg6: memref<1x128xf32, #tpu.memory_space<vmem>>, %arg7: memref<16x128xf32, #tpu.memory_space<vmem>>) attributes {dimension_semantics = [#tpu.dimension_semantics<parallel>], iteration_bounds = array<i64: 1>, scalar_prefetch = 0 : i64, scratch_operands = 0 : i64, tpu.core_type = #tpu.core_type<tc>, window_params = [{transform_indices = @transform_0, window_bounds = array<i64: 16, 8>}, {pipeline_mode = #tpu.pipeline_mode<synchronous>, transform_indices = @transform_1, window_bounds = array<i64: 128, 384>}, {pipeline_mode = #tpu.pipeline_mode<synchronous>, transform_indices = @transform_2, window_bounds = array<i64: 384, 512>}, {pipeline_mode = #tpu.pipeline_mode<synchronous>, transform_indices = @transform_3, window_bounds = array<i64: 1, 512>}, {pipeline_mode = #tpu.pipeline_mode<synchronous>, transform_indices = @transform_4, window_bounds = array<i64: 512, 128>}, {pipeline_mode = #tpu.pipeline_mode<synchronous>, transform_indices = @transform_5, window_bounds = array<i64: 1, 128>}, {transform_indices = @transform_6, window_bounds = array<i64: 16, 128>}]} {
    %c0 = arith.constant 0 : index
    %c0_0 = arith.constant 0 : index
    %0 = vector.load %arg1[%c0, %c0_0] : memref<16x8xi32, #tpu.memory_space<vmem>>, vector<16x8xi32>
    %1 = tpu.iota {dimensions = array<i32: 1>} : vector<1x128xi32>
    %cst = arith.constant 0.000000e+00 : f32
    %2 = vector.broadcast %cst : f32 to vector<16x128xf32>
    %3 = vector.extract_strided_slice %0 {offsets = [0, 0], sizes = [16, 1], strides = [1, 1]} : vector<16x8xi32> to vector<16x1xi32>
    %4 = vector.broadcast %3 : vector<16x1xi32> to vector<16x128xi32>
    %5 = vector.broadcast %1 : vector<1x128xi32> to vector<16x128xi32>
    %6 = arith.cmpi eq, %4, %5 : vector<16x128xi32>
    %7 = arith.extui %6 : vector<16x128xi1> to vector<16x128xi32>
    %8 = arith.sitofp %7 : vector<16x128xi32> to vector<16x128xf32>
    %9 = arith.addf %2, %8 : vector<16x128xf32>
    %10 = vector.extract_strided_slice %0 {offsets = [0, 1], sizes = [16, 1], strides = [1, 1]} : vector<16x8xi32> to vector<16x1xi32>
    %11 = vector.broadcast %10 : vector<16x1xi32> to vector<16x128xi32>
    %12 = vector.broadcast %1 : vector<1x128xi32> to vector<16x128xi32>
    %13 = arith.cmpi eq, %11, %12 : vector<16x128xi32>
    %14 = arith.extui %13 : vector<16x128xi1> to vector<16x128xi32>
    %15 = arith.sitofp %14 : vector<16x128xi32> to vector<16x128xf32>
    %16 = arith.addf %9, %15 : vector<16x128xf32>
    %17 = vector.extract_strided_slice %0 {offsets = [0, 2], sizes = [16, 1], strides = [1, 1]} : vector<16x8xi32> to vector<16x1xi32>
    %18 = vector.broadcast %17 : vector<16x1xi32> to vector<16x128xi32>
    %19 = vector.broadcast %1 : vector<1x128xi32> to vector<16x128xi32>
    %20 = arith.cmpi eq, %18, %19 : vector<16x128xi32>
    %21 = arith.extui %20 : vector<16x128xi1> to vector<16x128xi32>
    %22 = arith.sitofp %21 : vector<16x128xi32> to vector<16x128xf32>
    %23 = arith.addf %16, %22 : vector<16x128xf32>
    %24 = vector.extract_strided_slice %0 {offsets = [0, 3], sizes = [16, 1], strides = [1, 1]} : vector<16x8xi32> to vector<16x1xi32>
    %25 = vector.broadcast %24 : vector<16x1xi32> to vector<16x128xi32>
    %26 = vector.broadcast %1 : vector<1x128xi32> to vector<16x128xi32>
    %27 = arith.cmpi eq, %25, %26 : vector<16x128xi32>
    %28 = arith.extui %27 : vector<16x128xi1> to vector<16x128xi32>
    %29 = arith.sitofp %28 : vector<16x128xi32> to vector<16x128xf32>
    %30 = arith.addf %23, %29 : vector<16x128xf32>
    %31 = vector.extract_strided_slice %0 {offsets = [0, 4], sizes = [16, 1], strides = [1, 1]} : vector<16x8xi32> to vector<16x1xi32>
    %32 = vector.broadcast %31 : vector<16x1xi32> to vector<16x128xi32>
    %33 = vector.broadcast %1 : vector<1x128xi32> to vector<16x128xi32>
    %34 = arith.cmpi eq, %32, %33 : vector<16x128xi32>
    %35 = arith.extui %34 : vector<16x128xi1> to vector<16x128xi32>
    %36 = arith.sitofp %35 : vector<16x128xi32> to vector<16x128xf32>
    %37 = arith.addf %30, %36 : vector<16x128xf32>
    %38 = vector.extract_strided_slice %0 {offsets = [0, 5], sizes = [16, 1], strides = [1, 1]} : vector<16x8xi32> to vector<16x1xi32>
    %39 = vector.broadcast %38 : vector<16x1xi32> to vector<16x128xi32>
    %40 = vector.broadcast %1 : vector<1x128xi32> to vector<16x128xi32>
    %41 = arith.cmpi eq, %39, %40 : vector<16x128xi32>
    %42 = arith.extui %41 : vector<16x128xi1> to vector<16x128xi32>
    %43 = arith.sitofp %42 : vector<16x128xi32> to vector<16x128xf32>
    %44 = arith.addf %37, %43 : vector<16x128xf32>
    %45 = vector.extract_strided_slice %0 {offsets = [0, 6], sizes = [16, 1], strides = [1, 1]} : vector<16x8xi32> to vector<16x1xi32>
    %46 = vector.broadcast %45 : vector<16x1xi32> to vector<16x128xi32>
    %47 = vector.broadcast %1 : vector<1x128xi32> to vector<16x128xi32>
    %48 = arith.cmpi eq, %46, %47 : vector<16x128xi32>
    %49 = arith.extui %48 : vector<16x128xi1> to vector<16x128xi32>
    %50 = arith.sitofp %49 : vector<16x128xi32> to vector<16x128xf32>
    %51 = arith.addf %44, %50 : vector<16x128xf32>
    %52 = vector.extract_strided_slice %0 {offsets = [0, 7], sizes = [16, 1], strides = [1, 1]} : vector<16x8xi32> to vector<16x1xi32>
    %53 = vector.broadcast %52 : vector<16x1xi32> to vector<16x128xi32>
    %54 = vector.broadcast %1 : vector<1x128xi32> to vector<16x128xi32>
    %55 = arith.cmpi eq, %53, %54 : vector<16x128xi32>
    %56 = arith.extui %55 : vector<16x128xi1> to vector<16x128xi32>
    %57 = arith.sitofp %56 : vector<16x128xi32> to vector<16x128xf32>
    %58 = arith.addf %51, %57 : vector<16x128xf32>
    %cst_1 = arith.constant 1.250000e-01 : f32
    %59 = vector.broadcast %cst_1 : f32 to vector<16x128xf32>
    %60 = arith.mulf %58, %59 : vector<16x128xf32>
    %61 = arith.truncf %60 : vector<16x128xf32> to vector<16x128xbf16>
    %c0_2 = arith.constant 0 : index
    %c0_3 = arith.constant 0 : index
    %62 = vector.load %arg2[%c0_2, %c0_3] : memref<128x384xbf16, #tpu.memory_space<vmem>>, vector<128x384xbf16>
    %cst_4 = arith.constant dense<0.000000e+00> : vector<16x384xf32>
    %63 = tpu.matmul %61, %62, %cst_4 {dimension_numbers = #tpu.dot_dimension_numbers<[1], [0], [0], [1], [0, 0, 1, 1], [], []>} : vector<16x128xbf16>, vector<128x384xbf16>, vector<16x384xf32> -> vector<16x384xf32>
    %cst_5 = arith.constant 0.000000e+00 : f32
    %64 = vector.broadcast %cst_5 : f32 to vector<16x384xf32>
    %65 = arith.maximumf %63, %64 : vector<16x384xf32>
    %66 = arith.truncf %65 : vector<16x384xf32> to vector<16x384xbf16>
    %c0_6 = arith.constant 0 : index
    %c0_7 = arith.constant 0 : index
    %67 = vector.load %arg3[%c0_6, %c0_7] : memref<384x512xbf16, #tpu.memory_space<vmem>>, vector<384x512xbf16>
    %cst_8 = arith.constant dense<0.000000e+00> : vector<16x512xf32>
    %68 = tpu.matmul %66, %67, %cst_8 {dimension_numbers = #tpu.dot_dimension_numbers<[1], [0], [0], [1], [0, 0, 1, 1], [], []>} : vector<16x384xbf16>, vector<384x512xbf16>, vector<16x512xf32> -> vector<16x512xf32>
    %c0_9 = arith.constant 0 : index
    %c0_10 = arith.constant 0 : index
    %69 = vector.load %arg4[%c0_9, %c0_10] : memref<1x512xf32, #tpu.memory_space<vmem>>, vector<1x512xf32>
    %70 = vector.broadcast %69 : vector<1x512xf32> to vector<16x512xf32>
    %71 = arith.addf %68, %70 : vector<16x512xf32>
    %cst_11 = arith.constant 0.000000e+00 : f32
    %72 = vector.broadcast %cst_11 : f32 to vector<16x512xf32>
    %73 = arith.maximumf %71, %72 : vector<16x512xf32>
    %74 = arith.truncf %73 : vector<16x512xf32> to vector<16x512xbf16>
    %c0_12 = arith.constant 0 : index
    %c0_13 = arith.constant 0 : index
    %75 = vector.load %arg5[%c0_12, %c0_13] : memref<512x128xbf16, #tpu.memory_space<vmem>>, vector<512x128xbf16>
    %cst_14 = arith.constant dense<0.000000e+00> : vector<16x128xf32>
    %76 = tpu.matmul %74, %75, %cst_14 {dimension_numbers = #tpu.dot_dimension_numbers<[1], [0], [0], [1], [0, 0, 1, 1], [], []>} : vector<16x512xbf16>, vector<512x128xbf16>, vector<16x128xf32> -> vector<16x128xf32>
    %c0_15 = arith.constant 0 : index
    %c0_16 = arith.constant 0 : index
    %77 = vector.load %arg6[%c0_15, %c0_16] : memref<1x128xf32, #tpu.memory_space<vmem>>, vector<1x128xf32>
    %78 = vector.broadcast %77 : vector<1x128xf32> to vector<16x128xf32>
    %79 = arith.addf %76, %78 : vector<16x128xf32>
    %80 = arith.negf %79 : vector<16x128xf32>
    %81 = math.exp %80 : vector<16x128xf32>
    %cst_17 = arith.constant 1.000000e+00 : f32
    %82 = vector.broadcast %cst_17 : f32 to vector<16x128xf32>
    %83 = arith.addf %82, %81 : vector<16x128xf32>
    %84 = arith.divf %82, %83 : vector<16x128xf32>
    %c0_18 = arith.constant 0 : index
    %c0_19 = arith.constant 0 : index
    %85 = vector.load %arg7[%c0_18, %c0_19] : memref<16x128xf32, #tpu.memory_space<vmem>>, vector<16x128xf32>
    tpu.vector_store %arg7[%c0_18, %c0_19], %84 {strides = array<i32>} : memref<16x128xf32, #tpu.memory_space<vmem>>, vector<16x128xf32>,
    return
  }
  func.func @transform_0(%arg0: i32) -> (i32, i32) {
    %c0_i32 = arith.constant 0 : i32
    %c0_i32_0 = arith.constant 0 : i32
    return %arg0, %c0_i32 : i32, i32
  }
  func.func @transform_1(%arg0: i32) -> (i32, i32) {
    %c0_i32 = arith.constant 0 : i32
    %c0_i32_0 = arith.constant 0 : i32
    %c0_i32_1 = arith.constant 0 : i32
    return %c0_i32, %c0_i32_0 : i32, i32
  }
  func.func @transform_2(%arg0: i32) -> (i32, i32) {
    %c0_i32 = arith.constant 0 : i32
    %c0_i32_0 = arith.constant 0 : i32
    %c0_i32_1 = arith.constant 0 : i32
    return %c0_i32, %c0_i32_0 : i32, i32
  }
  func.func @transform_3(%arg0: i32) -> (i32, i32) {
    %c0_i32 = arith.constant 0 : i32
    %c0_i32_0 = arith.constant 0 : i32
    %c0_i32_1 = arith.constant 0 : i32
    return %c0_i32, %c0_i32_0 : i32, i32
  }
  func.func @transform_4(%arg0: i32) -> (i32, i32) {
    %c0_i32 = arith.constant 0 : i32
    %c0_i32_0 = arith.constant 0 : i32
    %c0_i32_1 = arith.constant 0 : i32
    return %c0_i32, %c0_i32_0 : i32, i32
  }
  func.func @transform_5(%arg0: i32) -> (i32, i32) {
    %c0_i32 = arith.constant 0 : i32
    %c0_i32_0 = arith.constant 0 : i32
    %c0_i32_1 = arith.constant 0 : i32
    return %c0_i32, %c0_i32_0 : i32, i32
  }
  func.func @transform_6(%arg0: i32) -> (i32, i32) {
    %c0_i32 = arith.constant 0 : i32
    %c0_i32_0 = arith.constant 0 : i32
    return %arg0, %c0_i32 : i32, i32
  }
}

</mosaic_0001>

<bundles_post_ra>
// kernel: tpu_custom_call.1
= control target key start
LH: loop header
LB: loop body
LE: loop exit
PB: predicated region body
PF: predicated region fallthrough
CT: control target
= control target key end

     0   :  { %11 = vsyncpa [#allocation3], 0  ;;  %s2374_s0 = inlined_call_operand.vmem [shape: s32[16,8], index: 0, kind: input, shape index: {}]   ;;  %s2375_s1 = inlined_call_operand.hbm [shape: bf16[128,384], index: 1, kind: input, shape index: {}]   ;;  %s2376_s2 = inlined_call_operand.hbm [shape: bf16[384,512], index: 2, kind: input, shape index: {}]   ;;  %s2377_s3 = inlined_call_operand.vmem [shape: f32[1,512], index: 3, kind: input, shape index: {}]   ;;  %s2378_s4 = inlined_call_operand.hbm [shape: bf16[512,128], index: 4, kind: input, shape index: {}]   ;;  %s2379_s5 = inlined_call_operand.vmem [shape: f32[1,128], index: 5, kind: input, shape index: {}]   ;;  %s2380_s6 = inlined_call_operand.hbm [shape: f32[16,128], index: 6, kind: output, shape index: {}]  }
   0x1   :  { %12 = vsyncpa [#allocation6], 0 }
   0x2   :  { %13 = vsyncpa [#allocation4], 0  ;;  %s2202_s21 = smov [#allocation5]   ;;  %s2108_s25 = scalar_lea.hbm %s2376_s2, 12288 }
   0x3   :  { %s33_s22 = sshll.u32 %s2202_s21, 4  ;;  %p2109_p0 = scmp.ne.s32.totalorder %s2376_s2, %s2108_s25  ;;  %s34_s22 = int_to_ptr.vmem [resolvable:$true] %s33_s22 }
   0x4   :  { %p2112_p1 = scmp.lt.u32.totalorder %s2108_s25, %s2376_s2 }
   0x6   :  { %p2114_p2 = pnand %p2112_p1, %p2109_p0 }
   0x8   :  { %2117 = shalt.err (!%p2114_p2)
}
   0x9   :  { %s2118_s30 = scalar_lea.vmem %s34_s22, 12288  ;;  %p2123_p4 = scmp.lt.s32.totalorder %s34_s22, %s34_s22 }
   0xa   :  { %p2119_p3 = scmp.ne.s32.totalorder %s34_s22, %s2118_s30  ;;  %p2124_p5 = scmp.lt.s32.totalorder %s2118_s30, %s2118_s30 }
   0xc   :  { %p2125_p6 = por %p2124_p5, %p2123_p4 }
   0xe   :  { %p2126_p7 = pnand %p2125_p6, %p2119_p3 }
  0x10   :  { %2129 = shalt.err (!%p2126_p7)
}
  0x11   :  { %s2203_s7 = smov 256   ;;  %s2204_s8 = smov 16  }
  0x12   :  { %39 = dma.hbm_to_vmem [thread:$0]  %s2376_s2, 12288, %s34_s22, [#allocation6], %s2203_s7, %s2203_s7, %s2204_s8  }
  0x13   :  { %s2205_s11 = smov [#allocation2]   ;;  %s2130_s15 = scalar_lea.hbm %s2375_s1, 3072 }
  0x14   :  { %s21_s12 = sshll.u32 %s2205_s11, 4  ;;  %p2131_p8 = scmp.ne.s32.totalorder %s2375_s1, %s2130_s15  ;;  %s22_s12 = int_to_ptr.vmem [resolvable:$true] %s21_s12 }
  0x15   :  { %p2134_p9 = scmp.lt.u32.totalorder %s2130_s15, %s2375_s1 }
  0x17   :  { %p2136_p10 = pnand %p2134_p9, %p2131_p8 }
  0x19   :  { %2139 = shalt.err (!%p2136_p10)
}
  0x1a   :  { %s2140_s20 = scalar_lea.vmem %s22_s12, 3072  ;;  %p2145_p12 = scmp.lt.s32.totalorder %s22_s12, %s22_s12 }
  0x1b   :  { %p2141_p11 = scmp.ne.s32.totalorder %s22_s12, %s2140_s20  ;;  %p2146_p13 = scmp.lt.s32.totalorder %s2140_s20, %s2140_s20 }
  0x1d   :  { %p2147_p0 = por %p2146_p13, %p2145_p12 }
  0x1f   :  { %p2148_p1 = pnand %p2147_p0, %p2141_p11 }
  0x21   :  { %2151 = shalt.err (!%p2148_p1)
}
  0x22   :  { %s2206_s2 = smov 192   ;;  %s2207_s21 = smov 12  }
  0x23   :  { %27 = dma.hbm_to_vmem [thread:$0]  %s2375_s1, 3072, %s22_s12, [#allocation3], %s2206_s2, %s2206_s2, %s2207_s21  }
  0x24   :  { %s2208_s24 = smov [#allocation7]   ;;  %s2152_s28 = scalar_lea.hbm %s2378_s4, 4096 }
  0x25   :  { %s47_s25 = sshll.u32 %s2208_s24, 4  ;;  %p2153_p2 = scmp.ne.s32.totalorder %s2378_s4, %s2152_s28  ;;  %s48_s25 = int_to_ptr.vmem [resolvable:$true] %s47_s25 }
  0x26   :  { %p2156_p3 = scmp.lt.u32.totalorder %s2152_s28, %s2378_s4 }
  0x28   :  { %p2158_p4 = pnand %p2156_p3, %p2153_p2 }
  0x2a   :  { %2161 = shalt.err (!%p2158_p4)
}
  0x2b   :  { %s2162_s9 = scalar_lea.vmem %s48_s25, 4096  ;;  %p2167_p6 = scmp.lt.s32.totalorder %s48_s25, %s48_s25 }
  0x2c   :  { %p2163_p5 = scmp.ne.s32.totalorder %s48_s25, %s2162_s9  ;;  %p2168_p7 = scmp.lt.s32.totalorder %s2162_s9, %s2162_s9 }
  0x2e   :  { %p2169_p8 = por %p2168_p7, %p2167_p6 }
  0x30   :  { %p2170_p9 = pnand %p2169_p8, %p2163_p5 }
  0x32   :  { %2173 = shalt.err (!%p2170_p9)
}
  0x33   :  { %s2209_s1 = smov 64   ;;  %s2210_s10 = smov 4  }
  0x34   :  { %53 = dma.hbm_to_vmem [thread:$0]  %s2378_s4, 4096, %s48_s25, [#allocation6], %s2209_s1, %s2209_s1, %s2210_s10  }
  0x35   :  { %2196 = dma.done.wait [#allocation3], 3072  }
  0x36   :  { %2197 = vsyncadd [#allocation3], 4294964224 }
  0x37   :  { %2198 = dma.done.wait [#allocation6], 16384  }
  0x38   :  { %2199 = vsyncadd [#allocation6], 4294950912  ;;  %v2211_v0 = vmov 1   ;;  %v2212_v1 = vmov 0   ;;  %v2213_v2 = vmov 0.0   ;;  %v2301_v3 = vld [vmem:[%s2374_s0] sm:$0xff]  ;;  %v68_v43 = vlaneseq }
  0x39   :  { %1880 = vset.pattern.permute.xlu1 %v2211_v0  ;;  %1879 = vset.pattern.permute.xlu0 %v2212_v1  ;;  %v2306_v4 = vld [vmem:[%s2374_s0 + $0x8] sm:$0xff]  ;;  %v2214_v5 = vmov 2   ;;  %v2215_v6 = vmov 3   ;;  %v1892_v7 = vld [vmem:[#allocation2 + $0x4] ss:$12 sps:$4 sm:$0xff]   ;;  %v2216_v10 = vmov 4  }
  0x3a   :  { %377 = vmatprep.mubr.bf16.mxu0 %v2212_v1  ;;  %1821 = vmatprep.subr.bf16.mxu1 %v2213_v2  ;;  %v1894_v8 = vld [vmem:[#allocation2] ss:$12 sps:$4 sm:$0xff]   ;;  %v1895_v9 = vld [vmem:[#allocation2 + $0x8] ss:$12 sps:$4 sm:$0xff]   ;;  %v2217_v11 = vmov 5   ;;  %v2218_v15 = vmov 6  }
  0x3b   :  { %85 = vperm.xlu1 %1880, %v2301_v3   ;;  %71 = vperm.xlu0 %1879, %v2301_v3   ;;  %v1896_v12 = vld [vmem:[#allocation2 + $0x1c] ss:$12 sps:$4 sm:$0xff]   ;;  %v1898_v13 = vld [vmem:[#allocation2 + $0x18] ss:$12 sps:$4 sm:$0xff]   ;;  %v1899_v14 = vld [vmem:[#allocation2 + $0x20] ss:$12 sps:$4 sm:$0xff]  }
  0x3c   :  { %345 = vmatprep.subr.bf16.mxu0 %v1892_v7  ;;  %1822 = vmatpush3.bf16.msra.mxu1 %v1895_v9  ;;  %v1900_v16 = vld [vmem:[#allocation2 + $0x34] ss:$12 sps:$4 sm:$0xff]   ;;  %v1902_v17 = vld [vmem:[#allocation2 + $0x30] ss:$12 sps:$4 sm:$0xff]   ;;  %v1903_v18 = vld [vmem:[#allocation2 + $0x38] ss:$12 sps:$4 sm:$0xff]  }
  0x3d   :  { %346 = vmatpush1.bf16.msra.mxu0 %v1894_v8  ;;  %1823 = vmatprep.subr.bf16.mxu1 %v2213_v2  ;;  %v1904_v19 = vld [vmem:[#allocation2 + $0x4c] ss:$12 sps:$4 sm:$0xff]   ;;  %v1906_v20 = vld [vmem:[#allocation2 + $0x48] ss:$12 sps:$4 sm:$0xff]   ;;  %v1907_v21 = vld [vmem:[#allocation2 + $0x50] ss:$12 sps:$4 sm:$0xff]  }
  0x3e   :  { %347 = vmatprep.subr.bf16.mxu0 %v1896_v12  ;;  %v2219_v22 = vmov 7   ;;  %v1908_v23 = vld [vmem:[#allocation2 + $0x64] ss:$12 sps:$4 sm:$0xff]   ;;  %v1910_v24 = vld [vmem:[#allocation2 + $0x60] ss:$12 sps:$4 sm:$0xff]   ;;  %vm2220_vm0 = vmmov 0  }
  0x3f   :  { %88 = vperm.xlu1 %1880, %v2306_v4   ;;  %74 = vperm.xlu0 %1879, %v2306_v4   ;;  %v1911_v25 = vld [vmem:[#allocation2 + $0x68] ss:$12 sps:$4 sm:$0xff]   ;;  %v1914_v27 = vld [vmem:[#allocation2 + $0x78] ss:$12 sps:$4 sm:$0xff]   ;;  %v1915_v28 = vld [vmem:[#allocation2 + $0x80] ss:$12 sps:$4 sm:$0xff]  }
  0x40   :  { %1824 = vmatpush3.bf16.msra.mxu1 %v1899_v14  ;;  %v1912_v26 = vld [vmem:[#allocation2 + $0x7c] ss:$12 sps:$4 sm:$0xff]   ;;  %v1916_v29 = vld [vmem:[#allocation2 + $0x94] ss:$12 sps:$4 sm:$0xff]   ;;  %v1919_v31 = vld [vmem:[#allocation2 + $0x98] ss:$12 sps:$4 sm:$0xff]   ;;  %1837 = vmatprep.mubr.msk.bf16.mxu1 %vm2220_vm0, %v2213_v2 }
  0x41   :  { %348 = vmatpush1.bf16.msra.mxu0 %v1898_v13  ;;  %1825 = vmatprep.subr.bf16.mxu1 %v2213_v2  ;;  %v1918_v30 = vld [vmem:[#allocation2 + $0x90] ss:$12 sps:$4 sm:$0xff]   ;;  %v1920_v32 = vld [vmem:[#allocation2 + $0xac] ss:$12 sps:$4 sm:$0xff]   ;;  %v1922_v33 = vld [vmem:[#allocation2 + $0xa8] ss:$12 sps:$4 sm:$0xff]  }
  0x42   :  { %349 = vmatprep.subr.bf16.mxu0 %v1900_v16  ;;  %v1923_v34 = vld [vmem:[#allocation2 + $0xb0] ss:$12 sps:$4 sm:$0xff]   ;;  %v1926_v35 = vld [vmem:[#allocation5 + $0x4] ss:$16 sps:$4 sm:$0xff]   ;;  %v69_v44 = vand.u32 127, %v68_v43 }
  0x43   :  { %1882 = vset.pattern.permute.xlu1 %v2214_v5  ;;  %1881 = vset.pattern.permute.xlu0 %v2214_v5  ;;  %v1929_v36 = vld [vmem:[#allocation5 + $0xc] ss:$16 sps:$4 sm:$0xff]  }
  0x44   :  { %102 = vperm.xlu1 %1882, %v2306_v4   ;;  %99 = vperm.xlu0 %1881, %v2301_v3  }
  0x45   :  { %1826 = vmatpush3.bf16.msra.mxu1 %v1903_v18  ;;  %350 = vmatpush1.bf16.msra.mxu0 %v1902_v17 }
  0x46   :  { %1827 = vmatprep.subr.bf16.mxu1 %v2213_v2  ;;  %351 = vmatprep.subr.bf16.mxu0 %v1904_v19 }
  0x48   :  { %1883 = vset.pattern.permute.xlu1 %v2215_v6  ;;  %1884 = vset.pattern.permute.xlu0 %v2215_v6 }
  0x49   :  { %113 = vperm.xlu1 %1883, %v2301_v3   ;;  %116 = vperm.xlu0 %1884, %v2306_v4  }
  0x4a   :  { %1828 = vmatpush3.bf16.msra.mxu1 %v1907_v21  ;;  %352 = vmatpush1.bf16.msra.mxu0 %v1906_v20 }
  0x4b   :  { %353 = vmatprep.subr.bf16.mxu0 %v1908_v23  ;;  %1829 = vmatprep.subr.bf16.mxu1 %v2213_v2 }
  0x4d   :  { %1885 = vset.pattern.permute.xlu1 %v2216_v10  ;;  %1886 = vset.pattern.permute.xlu0 %v2217_v11 }
  0x4e   :  { %127 = vperm.xlu1 %1885, %v2301_v3   ;;  %141 = vperm.xlu0 %1886, %v2301_v3  }
  0x4f   :  { %1830 = vmatpush3.bf16.msra.mxu1 %v1911_v25  ;;  %354 = vmatpush1.bf16.msra.mxu0 %v1910_v24  ;;  %v1924_v25 = vld [vmem:[#allocation5] ss:$16 sps:$4 sm:$0xff]  }
  0x50   :  { %355 = vmatprep.subr.bf16.mxu0 %v1912_v26  ;;  %1831 = vmatprep.subr.bf16.mxu1 %v2213_v2  ;;  %v1927_v26 = vld [vmem:[#allocation5 + $0x8] ss:$16 sps:$4 sm:$0xff]  }
  0x52   :  { %130 = vperm.xlu1 %1885, %v2306_v4   ;;  %1889 = vset.pattern.permute.xlu0 %v2218_v15 }
  0x53   :  { %158 = vperm.xlu0 %1889, %v2306_v4   ;;  %1832 = vmatpush3.bf16.msra.mxu1 %v1915_v28  ;;  %v1932_v28 = vld [vmem:[#allocation5 + $0x24] ss:$16 sps:$4 sm:$0xff]  }
  0x54   :  { %356 = vmatpush1.bf16.msra.mxu0 %v1914_v27  ;;  %1833 = vmatprep.subr.bf16.mxu1 %v2213_v2 }
  0x55   :  { %357 = vmatprep.subr.bf16.mxu0 %v1916_v29  ;;  %v1935_v29 = vld [vmem:[#allocation5 + $0x2c] ss:$16 sps:$4 sm:$0xff]  }
  0x56   :  { %1887 = vset.pattern.permute.xlu1 %v2217_v11 }
  0x57   :  { %144 = vperm.xlu1 %1887, %v2306_v4   ;;  %1891 = vset.pattern.permute.xlu0 %v2219_v22 }
  0x58   :  { %1834 = vmatpush3.bf16.msra.mxu1 %v1919_v31  ;;  %358 = vmatpush1.bf16.msra.mxu0 %v1918_v30  ;;  %v1930_v30 = vld [vmem:[#allocation5 + $0x20] ss:$16 sps:$4 sm:$0xff]   ;;  %v1933_v31 = vld [vmem:[#allocation5 + $0x28] ss:$16 sps:$4 sm:$0xff]  }
  0x59   :  { %1835 = vmatprep.subr.bf16.mxu1 %v2213_v2  ;;  %359 = vmatprep.subr.bf16.mxu0 %v1920_v32  ;;  %v1938_v32 = vld [vmem:[#allocation5 + $0x44] ss:$16 sps:$4 sm:$0xff]  }
  0x5b   :  { %1888 = vset.pattern.permute.xlu1 %v2218_v15 }
  0x5c   :  { %155 = vperm.xlu1 %1888, %v2301_v3   ;;  %1836 = vmatpush3.bf16.msra.mxu1 %v1923_v34  ;;  %v1939_v34 = vld [vmem:[#allocation5 + $0x48] ss:$16 sps:$4 sm:$0xff]  }
  0x5d   :  { %360 = vmatpush1.bf16.msra.mxu0 %v1922_v33  ;;  %1122 = vmatprep.subr.bf16.mxu1 %v1929_v36  ;;  %v1941_v33 = vld [vmem:[#allocation5 + $0x4c] ss:$16 sps:$4 sm:$0xff]  }
  0x5e   :  { %1036 = vmatprep.subr.bf16.mxu0 %v1926_v35  ;;  %v1944_v35 = vld [vmem:[#allocation5 + $0x64] ss:$16 sps:$4 sm:$0xff]   ;;  %v1947_v36 = vld [vmem:[#allocation5 + $0x6c] ss:$16 sps:$4 sm:$0xff]  }
  0x60   :  { %1890 = vset.pattern.permute.xlu1 %v2219_v22 }
  0x61   :  { %169 = vperm.xlu1 %1890, %v2301_v3  }
  0x65   :  { %172 = vperm.xlu1 %1890, %v2306_v4  }
  0xba   :  { %v86_v37 = vpop.permute.xlu1 %85  ;;  %v72_v39 = vpop.permute.xlu0 %71 }
  0xbb   :  { %vm90_vm1 = vcmp.eq.s32.totalorder %v86_v37, %v69_v44  ;;  %vm76_vm2 = vcmp.eq.s32.totalorder %v72_v39, %v69_v44  ;;  %v1942_v37 = vld [vmem:[#allocation5 + $0x60] ss:$16 sps:$4 sm:$0xff]   ;;  %v1950_v39 = vld [vmem:[#allocation5 + $0x84] ss:$16 sps:$4 sm:$0xff]  }
  0xbc   :  { %v1599_v48 = vsel %vm90_vm1, 1.0, %v2213_v2  ;;  %v1597_v49 = vsel %vm76_vm2, 1.0, %v2213_v2 }
  0xbd   :  { %v96_v55 = vadd.f32 %v1599_v48, %v1597_v49  ;;  %v1962_v48 = vld [vmem:[#allocation5 + $0xc4] ss:$16 sps:$4 sm:$0xff]   ;;  %v1965_v49 = vld [vmem:[#allocation5 + $0xcc] ss:$16 sps:$4 sm:$0xff]  }
  0xbe   :  { %v89_v38 = vpop.permute.xlu1 %88  ;;  %v75_v41 = vpop.permute.xlu0 %74 }
  0xbf   :  { %vm91_vm3 = vcmp.eq.s32.totalorder %v89_v38, %v69_v44  ;;  %vm77_vm4 = vcmp.eq.s32.totalorder %v75_v41, %v69_v44  ;;  %v1945_v38 = vld [vmem:[#allocation5 + $0x68] ss:$16 sps:$4 sm:$0xff]   ;;  %v1948_v41 = vld [vmem:[#allocation5 + $0x80] ss:$16 sps:$4 sm:$0xff]  }
  0xc0   :  { %v1600_v51 = vsel %vm91_vm3, 1.0, %v2213_v2  ;;  %v1598_v52 = vsel %vm77_vm4, 1.0, %v2213_v2 }
  0xc1   :  { %v97_v59 = vadd.f32 %v1600_v51, %v1598_v52  ;;  %v1963_v51 = vld [vmem:[#allocation5 + $0xc8] ss:$16 sps:$4 sm:$0xff]   ;;  %v1968_v52 = vld [vmem:[#allocation5 + $0xe4] ss:$16 sps:$4 sm:$0xff]  }
  0xc3   :  { %v103_v40 = vpop.permute.xlu1 %102  ;;  %v100_v46 = vpop.permute.xlu0 %99 }
  0xc4   :  { %vm104_vm5 = vcmp.eq.s32.totalorder %v100_v46, %v69_v44  ;;  %vm105_vm6 = vcmp.eq.s32.totalorder %v103_v40, %v69_v44  ;;  %v1953_v40 = vld [vmem:[#allocation5 + $0x8c] ss:$16 sps:$4 sm:$0xff]   ;;  %v1954_v46 = vld [vmem:[#allocation5 + $0xa0] ss:$16 sps:$4 sm:$0xff]  }
  0xc5   :  { %v1601_v53 = vsel %vm104_vm5, 1.0, %v2213_v2  ;;  %v1602_v56 = vsel %vm105_vm6, 1.0, %v2213_v2 }
  0xc6   :  { %v110_v60 = vadd.f32 %v1601_v53, %v96_v55  ;;  %v111_v63 = vadd.f32 %v1602_v56, %v97_v59  ;;  %v1971_v53 = vld [vmem:[#allocation5 + $0xec] ss:$16 sps:$4 sm:$0xff]   ;;  %v1969_v55 = vld [vmem:[#allocation5 + $0xe8] ss:$16 sps:$4 sm:$0xff]   ;;  %v1974_v56 = vld [vmem:[#allocation5 + $0x104] ss:$16 sps:$4 sm:$0xff]  }
  0xc7   :  { %v1975_v59 = vld [vmem:[#allocation5 + $0x108] ss:$16 sps:$4 sm:$0xff]  }
  0xc8   :  { %v114_v42 = vpop.permute.xlu1 %113  ;;  %v117_v50 = vpop.permute.xlu0 %116 }
  0xc9   :  { %vm118_vm7 = vcmp.eq.s32.totalorder %v114_v42, %v69_v44  ;;  %vm119_vm8 = vcmp.eq.s32.totalorder %v117_v50, %v69_v44  ;;  %v1951_v42 = vld [vmem:[#allocation5 + $0x88] ss:$16 sps:$4 sm:$0xff]   ;;  %v1960_v50 = vld [vmem:[#allocation5 + $0xc0] ss:$16 sps:$4 sm:$0xff]  }
  0xca   :  { %v1603_v57 = vsel %vm118_vm7, 1.0, %v2213_v2  ;;  %v1604_v61 = vsel %vm119_vm8, 1.0, %v2213_v2 }
  0xcb   :  { %v124_v0 = vadd.f32 %v1603_v57, %v110_v60  ;;  %v125_v6 = vadd.f32 %v1604_v61, %v111_v63  ;;  %v1977_v57 = vld [vmem:[#allocation5 + $0x10c] ss:$16 sps:$4 sm:$0xff]   ;;  %v1980_v60 = vld [vmem:[#allocation5 + $0x124] ss:$16 sps:$4 sm:$0xff]   ;;  %v1981_v63 = vld [vmem:[#allocation5 + $0x128] ss:$16 sps:$4 sm:$0xff]  }
  0xcc   :  { %v1983_v61 = vld [vmem:[#allocation5 + $0x12c] ss:$16 sps:$4 sm:$0xff]  }
  0xcd   :  { %v128_v45 = vpop.permute.xlu1 %127  ;;  %v142_v58 = vpop.permute.xlu0 %141 }
  0xce   :  { %vm132_vm9 = vcmp.eq.s32.totalorder %v128_v45, %v69_v44  ;;  %vm146_vm11 = vcmp.eq.s32.totalorder %v142_v58, %v69_v44  ;;  %v1959_v45 = vld [vmem:[#allocation5 + $0xac] ss:$16 sps:$4 sm:$0xff]   ;;  %v1972_v58 = vld [vmem:[#allocation5 + $0x100] ss:$16 sps:$4 sm:$0xff]  }
  0xcf   :  { %v1605_v62 = vsel %vm132_vm9, 1.0, %v2213_v2  ;;  %v1607_v8 = vsel %vm146_vm11, 1.0, %v2213_v2 }
  0xd0   :  { %v138_v7 = vadd.f32 %v1605_v62, %v124_v0  ;;  %v1978_v62 = vld [vmem:[#allocation5 + $0x120] ss:$16 sps:$4 sm:$0xff]   ;;  %v1986_v0 = vld [vmem:[#allocation5 + $0x144] ss:$16 sps:$4 sm:$0xff]  }
  0xd1   :  { %v131_v47 = vpop.permute.xlu1 %130 }
  0xd2   :  { %vm133_vm10 = vcmp.eq.s32.totalorder %v131_v47, %v69_v44  ;;  %v159_v5 = vpop.permute.xlu0 %158  ;;  %v152_v13 = vadd.f32 %v1607_v8, %v138_v7  ;;  %v1957_v47 = vld [vmem:[#allocation5 + $0xa8] ss:$16 sps:$4 sm:$0xff]   ;;  %v1995_v7 = vld [vmem:[#allocation5 + $0x16c] ss:$16 sps:$4 sm:$0xff]   ;;  %v1990_v8 = vld [vmem:[#allocation5 + $0x160] ss:$16 sps:$4 sm:$0xff]  }
  0xd3   :  { %v1606_v4 = vsel %vm133_vm10, 1.0, %v2213_v2  ;;  %vm161_vm14 = vcmp.eq.s32.totalorder %v159_v5, %v69_v44  ;;  %v1987_v5 = vld [vmem:[#allocation5 + $0x148] ss:$16 sps:$4 sm:$0xff]  }
  0xd4   :  { %v139_v10 = vadd.f32 %v1606_v4, %v125_v6  ;;  %v1610_v15 = vsel %vm161_vm14, 1.0, %v2213_v2  ;;  %v1984_v4 = vld [vmem:[#allocation5 + $0x140] ss:$16 sps:$4 sm:$0xff]   ;;  %v1992_v6 = vld [vmem:[#allocation5 + $0x164] ss:$16 sps:$4 sm:$0xff]  }
  0xd6   :  { %v145_v54 = vpop.permute.xlu1 %144 }
  0xd7   :  { %vm147_vm12 = vcmp.eq.s32.totalorder %v145_v54, %v69_v44  ;;  %v1966_v54 = vld [vmem:[#allocation5 + $0xe0] ss:$16 sps:$4 sm:$0xff]  }
  0xd8   :  { %v1608_v9 = vsel %vm147_vm12, 1.0, %v2213_v2 }
  0xd9   :  { %v153_v14 = vadd.f32 %v1608_v9, %v139_v10  ;;  %v1993_v9 = vld [vmem:[#allocation5 + $0x168] ss:$16 sps:$4 sm:$0xff]   ;;  %v1998_v10 = vld [vmem:[#allocation5 + $0x184] ss:$16 sps:$4 sm:$0xff]  }
  0xdb   :  { %v156_v3 = vpop.permute.xlu1 %155  ;;  %v167_v19 = vadd.f32 %v1610_v15, %v153_v14  ;;  %v2004_v14 = vld [vmem:[#allocation5 + $0x1a4] ss:$16 sps:$4 sm:$0xff]   ;;  %v2007_v15 = vld [vmem:[#allocation5 + $0x1ac] ss:$16 sps:$4 sm:$0xff]  }
  0xdc   :  { %vm160_vm13 = vcmp.eq.s32.totalorder %v156_v3, %v69_v44  ;;  %v1989_v3 = vld [vmem:[#allocation5 + $0x14c] ss:$16 sps:$4 sm:$0xff]  }
  0xdd   :  { %v1609_v11 = vsel %vm160_vm13, 1.0, %v2213_v2 }
  0xde   :  { %v166_v17 = vadd.f32 %v1609_v11, %v152_v13  ;;  %v2001_v11 = vld [vmem:[#allocation5 + $0x18c] ss:$16 sps:$4 sm:$0xff]   ;;  %v1999_v13 = vld [vmem:[#allocation5 + $0x188] ss:$16 sps:$4 sm:$0xff]  }
  0xe0   :  { %v170_v12 = vpop.permute.xlu1 %169 }
  0xe1   :  { %vm174_vm15 = vcmp.eq.s32.totalorder %v170_v12, %v69_v44  ;;  %v1996_v12 = vld [vmem:[#allocation5 + $0x180] ss:$16 sps:$4 sm:$0xff]  }
  0xe2   :  { %v1611_v16 = vsel %vm174_vm15, 1.0, %v2213_v2 }
  0xe3   :  { %v180_v20 = vadd.f32 %v1611_v16, %v166_v17  ;;  %v2002_v16 = vld [vmem:[#allocation5 + $0x1a0] ss:$16 sps:$4 sm:$0xff]   ;;  %v2005_v17 = vld [vmem:[#allocation5 + $0x1a8] ss:$16 sps:$4 sm:$0xff]  }
  0xe4   :  { %v173_v18 = vpop.permute.xlu1 %172 }
  0xe5   :  { %vm175_vm0 = vcmp.eq.s32.totalorder %v173_v18, %v69_v44  ;;  %v182_v23 = vmul.f32 0.125, %v180_v20  ;;  %v1956_v44 = vld [vmem:[#allocation5 + $0xa4] ss:$16 sps:$4 sm:$0xff]   ;;  %v2008_v20 = vld [vmem:[#allocation5 + $0x1c0] ss:$16 sps:$4 sm:$0xff]  }
  0xe6   :  { %v1612_v21 = vsel %vm175_vm0, 1.0, %v2213_v2  ;;  %v1936_v2 = vld [vmem:[#allocation5 + $0x40] ss:$16 sps:$4 sm:$0xff]   ;;  %v2010_v18 = vld [vmem:[#allocation5 + $0x1c4] ss:$16 sps:$4 sm:$0xff]  }
  0xe7   :  { %v181_v22 = vadd.f32 %v1612_v21, %v167_v19  ;;  %v2013_v19 = vld [vmem:[#allocation5 + $0x1cc] ss:$16 sps:$4 sm:$0xff]   ;;  %v2011_v21 = vld [vmem:[#allocation5 + $0x1c8] ss:$16 sps:$4 sm:$0xff]  }
  0xe9   :  { %v183_v24 = vmul.f32 0.125, %v181_v22  ;;  %v2016_v22 = vld [vmem:[#allocation5 + $0x1e4] ss:$16 sps:$4 sm:$0xff]  }
  0xeb   :  { %v184_v27 = vpack.c.bf16 %v183_v24, %v182_v23  ;;  %v2019_v23 = vld [vmem:[#allocation5 + $0x1ec] ss:$16 sps:$4 sm:$0xff]   ;;  %v2014_v24 = vld [vmem:[#allocation5 + $0x1e0] ss:$16 sps:$4 sm:$0xff]  }
  0xed   :  { %378 = vmatmul.mubr.bf16.vlgmr.msra.gmra.mrb[0].mxu0 %v184_v27  ;;  %1838 = vmatmul.mubr.bf16.vlgmr.msra.gmra.mrb[0].mxu1 %v184_v27  ;;  %v2025_v27 = vld [vmem:[#allocation5 + $0x20c] ss:$16 sps:$4 sm:$0xff]  }
  0xee   :  { %1037 = vmatpush1.bf16.msra.mxu0 %v1924_v25  ;;  %1123 = vmatpush1.bf16.msra.mxu1 %v1927_v26  ;;  %v2017_v25 = vld [vmem:[#allocation5 + $0x1e8] ss:$16 sps:$4 sm:$0xff]   ;;  %v2022_v26 = vld [vmem:[#allocation5 + $0x204] ss:$16 sps:$4 sm:$0xff]  }
  0xef   :  { %1038 = vmatprep.subr.bf16.mxu0 %v1932_v28  ;;  %1124 = vmatprep.subr.bf16.mxu1 %v1935_v29 }
  0xf2   :  { %1039 = vmatpush1.bf16.msra.mxu0 %v1930_v30  ;;  %1125 = vmatpush1.bf16.msra.mxu1 %v1933_v31 }
  0xf3   :  { %1040 = vmatprep.subr.bf16.mxu0 %v1938_v32  ;;  %1126 = vmatprep.subr.bf16.mxu1 %v1941_v33 }
  0xf6   :  { %1041 = vmatpush1.bf16.msra.mxu0 %v1936_v2  ;;  %1127 = vmatpush1.bf16.msra.mxu1 %v1939_v34 }
  0xf7   :  { %1042 = vmatprep.subr.bf16.mxu0 %v1944_v35  ;;  %1128 = vmatprep.subr.bf16.mxu1 %v1947_v36 }
  0xfa   :  { %1043 = vmatpush1.bf16.msra.mxu0 %v1942_v37  ;;  %1129 = vmatpush1.bf16.msra.mxu1 %v1945_v38 }
  0xfb   :  { %1044 = vmatprep.subr.bf16.mxu0 %v1950_v39  ;;  %1130 = vmatprep.subr.bf16.mxu1 %v1953_v40 }
  0xfe   :  { %1045 = vmatpush1.bf16.msra.mxu0 %v1948_v41  ;;  %1131 = vmatpush1.bf16.msra.mxu1 %v1951_v42 }
  0xff   :  { %1046 = vmatprep.subr.bf16.mxu0 %v1956_v44  ;;  %1132 = vmatprep.subr.bf16.mxu1 %v1959_v45  ;;  %v2020_v45 = vld [vmem:[#allocation5 + $0x200] ss:$16 sps:$4 sm:$0xff]  }
 0x102   :  { %1047 = vmatpush1.bf16.msra.mxu0 %v1954_v46  ;;  %1133 = vmatpush1.bf16.msra.mxu1 %v1957_v47  ;;  %v2023_v46 = vld [vmem:[#allocation5 + $0x208] ss:$16 sps:$4 sm:$0xff]   ;;  %v2028_v47 = vld [vmem:[#allocation5 + $0x224] ss:$16 sps:$4 sm:$0xff]  }
 0x103   :  { %1048 = vmatprep.subr.bf16.mxu0 %v1962_v48  ;;  %1134 = vmatprep.subr.bf16.mxu1 %v1965_v49  ;;  %v2031_v48 = vld [vmem:[#allocation5 + $0x22c] ss:$16 sps:$4 sm:$0xff]   ;;  %v2026_v49 = vld [vmem:[#allocation5 + $0x220] ss:$16 sps:$4 sm:$0xff]  }
 0x106   :  { %1049 = vmatpush1.bf16.msra.mxu0 %v1960_v50  ;;  %1135 = vmatpush1.bf16.msra.mxu1 %v1963_v51  ;;  %v2029_v50 = vld [vmem:[#allocation5 + $0x228] ss:$16 sps:$4 sm:$0xff]   ;;  %v2034_v51 = vld [vmem:[#allocation5 + $0x244] ss:$16 sps:$4 sm:$0xff]  }
 0x107   :  { %1050 = vmatprep.subr.bf16.mxu0 %v1968_v52  ;;  %1136 = vmatprep.subr.bf16.mxu1 %v1971_v53  ;;  %v2037_v52 = vld [vmem:[#allocation5 + $0x24c] ss:$16 sps:$4 sm:$0xff]   ;;  %v2032_v53 = vld [vmem:[#allocation5 + $0x240] ss:$16 sps:$4 sm:$0xff]  }
 0x10a   :  { %1051 = vmatpush1.bf16.msra.mxu0 %v1966_v54  ;;  %1137 = vmatpush1.bf16.msra.mxu1 %v1969_v55  ;;  %v2035_v54 = vld [vmem:[#allocation5 + $0x248] ss:$16 sps:$4 sm:$0xff]   ;;  %v2040_v55 = vld [vmem:[#allocation5 + $0x264] ss:$16 sps:$4 sm:$0xff]  }
 0x10b   :  { %1052 = vmatprep.subr.bf16.mxu0 %v1974_v56  ;;  %1138 = vmatprep.subr.bf16.mxu1 %v1977_v57  ;;  %v2043_v56 = vld [vmem:[#allocation5 + $0x26c] ss:$16 sps:$4 sm:$0xff]   ;;  %v2038_v57 = vld [vmem:[#allocation5 + $0x260] ss:$16 sps:$4 sm:$0xff]  }
 0x10e   :  { %1053 = vmatpush1.bf16.msra.mxu0 %v1972_v58  ;;  %1139 = vmatpush1.bf16.msra.mxu1 %v1975_v59  ;;  %v2041_v58 = vld [vmem:[#allocation5 + $0x268] ss:$16 sps:$4 sm:$0xff]   ;;  %v2046_v59 = vld [vmem:[#allocation5 + $0x284] ss:$16 sps:$4 sm:$0xff]  }
 0x10f   :  { %1054 = vmatprep.subr.bf16.mxu0 %v1980_v60  ;;  %1140 = vmatprep.subr.bf16.mxu1 %v1983_v61  ;;  %v2049_v60 = vld [vmem:[#allocation5 + $0x28c] ss:$16 sps:$4 sm:$0xff]   ;;  %v2044_v61 = vld [vmem:[#allocation5 + $0x280] ss:$16 sps:$4 sm:$0xff]  }
 0x112   :  { %1055 = vmatpush1.bf16.msra.mxu0 %v1978_v62  ;;  %1141 = vmatpush1.bf16.msra.mxu1 %v1981_v63  ;;  %v2052_v62 = vld [vmem:[#allocation5 + $0x2a4] ss:$16 sps:$4 sm:$0xff]   ;;  %v2055_v63 = vld [vmem:[#allocation5 + $0x2ac] ss:$16 sps:$4 sm:$0xff]  }
 0x113   :  { %1056 = vmatprep.subr.bf16.mxu0 %v1986_v0  ;;  %1142 = vmatprep.subr.bf16.mxu1 %v1989_v3  ;;  %v2050_v0 = vld [vmem:[#allocation5 + $0x2a0] ss:$16 sps:$4 sm:$0xff]   ;;  %v2053_v3 = vld [vmem:[#allocation5 + $0x2a8] ss:$16 sps:$4 sm:$0xff]  }
 0x116   :  { %1057 = vmatpush1.bf16.msra.mxu0 %v1984_v4  ;;  %1143 = vmatpush1.bf16.msra.mxu1 %v1987_v5  ;;  %v2058_v4 = vld [vmem:[#allocation5 + $0x2c4] ss:$16 sps:$4 sm:$0xff]   ;;  %v2061_v5 = vld [vmem:[#allocation5 + $0x2cc] ss:$16 sps:$4 sm:$0xff]  }
 0x117   :  { %1058 = vmatprep.subr.bf16.mxu0 %v1992_v6  ;;  %1144 = vmatprep.subr.bf16.mxu1 %v1995_v7  ;;  %v2056_v6 = vld [vmem:[#allocation5 + $0x2c0] ss:$16 sps:$4 sm:$0xff]   ;;  %v2059_v7 = vld [vmem:[#allocation5 + $0x2c8] ss:$16 sps:$4 sm:$0xff]  }
 0x11a   :  { %1059 = vmatpush1.bf16.msra.mxu0 %v1990_v8  ;;  %1145 = vmatpush1.bf16.msra.mxu1 %v1993_v9  ;;  %v2064_v8 = vld [vmem:[#allocation5 + $0x2e4] ss:$16 sps:$4 sm:$0xff]   ;;  %v2067_v9 = vld [vmem:[#allocation5 + $0x2ec] ss:$16 sps:$4 sm:$0xff]  }
 0x11b   :  { %1060 = vmatprep.subr.bf16.mxu0 %v1998_v10  ;;  %1146 = vmatprep.subr.bf16.mxu1 %v2001_v11  ;;  %v2062_v10 = vld [vmem:[#allocation5 + $0x2e0] ss:$16 sps:$4 sm:$0xff]   ;;  %v2065_v11 = vld [vmem:[#allocation5 + $0x2e8] ss:$16 sps:$4 sm:$0xff]  }
 0x11e   :  { %1061 = vmatpush1.bf16.msra.mxu0 %v1996_v12  ;;  %1147 = vmatpush1.bf16.msra.mxu1 %v1999_v13  ;;  %v2068_v12 = vld [vmem:[#allocation7 + $0x40] sm:$0xff]  }
 0x11f   :  { %1062 = vmatprep.subr.bf16.mxu0 %v2004_v14  ;;  %1148 = vmatprep.subr.bf16.mxu1 %v2007_v15  ;;  %v2069_v13 = vld [vmem:[#allocation7 + $0xc0] sm:$0xff]  }
 0x120   :  { %v2070_v14 = vld [vmem:[#allocation7] sm:$0xff]  }
 0x121   :  { %v2071_v15 = vld [vmem:[#allocation7 + $0x80] sm:$0xff]  }
 0x122   :  { %1063 = vmatpush1.bf16.msra.mxu0 %v2002_v16  ;;  %1149 = vmatpush1.bf16.msra.mxu1 %v2005_v17  ;;  %v2072_v16 = vld [vmem:[#allocation7 + $0x48] sm:$0xff]  }
 0x123   :  { %1064 = vmatprep.subr.bf16.mxu0 %v2010_v18  ;;  %1150 = vmatprep.subr.bf16.mxu1 %v2013_v19  ;;  %v2073_v17 = vld [vmem:[#allocation7 + $0xc8] sm:$0xff]  }
 0x124   :  { %v2074_v18 = vld [vmem:[#allocation7 + $0x8] sm:$0xff]  }
 0x125   :  { %v2075_v19 = vld [vmem:[#allocation7 + $0x88] sm:$0xff]  }
 0x126   :  { %1065 = vmatpush1.bf16.msra.mxu0 %v2008_v20  ;;  %1151 = vmatpush1.bf16.msra.mxu1 %v2011_v21  ;;  %v2076_v20 = vld [vmem:[#allocation7 + $0x50] sm:$0xff]  }
 0x127   :  { %1066 = vmatprep.subr.bf16.mxu0 %v2016_v22  ;;  %1152 = vmatprep.subr.bf16.mxu1 %v2019_v23  ;;  %v2077_v21 = vld [vmem:[#allocation7 + $0xd0] sm:$0xff]  }
 0x128   :  { %v2078_v22 = vld [vmem:[#allocation7 + $0x10] sm:$0xff]  }
 0x129   :  { %v2079_v23 = vld [vmem:[#allocation7 + $0x90] sm:$0xff]  }
 0x12a   :  { %1067 = vmatpush1.bf16.msra.mxu0 %v2014_v24  ;;  %1153 = vmatpush1.bf16.msra.mxu1 %v2017_v25  ;;  %v2080_v24 = vld [vmem:[#allocation7 + $0x58] sm:$0xff]  }
 0x12b   :  { %1079 = vmatprep.subr.bf16.mxu0 %v2022_v26  ;;  %1165 = vmatprep.subr.bf16.mxu1 %v2025_v27  ;;  %v2081_v25 = vld [vmem:[#allocation7 + $0xd8] sm:$0xff]  }
 0x12c   :  { %v2082_v26 = vld [vmem:[#allocation7 + $0x18] sm:$0xff]  }
 0x12d   :  { %v2083_v27 = vld [vmem:[#allocation7 + $0x98] sm:$0xff]  }
 0x1c0   :  { %v379_v28 = vpop.f32.mrb[0].mxu0  ;;  %v422_v29 = vpop.f32.mrb[0].mxu1 }
 0x1c1   :  { %v381_v30 = vpop.f32.mrb[1].mxu0  ;;  %v1839_v31 = vpop.f32.mrb[1].mxu1  ;;  %v429_v2 = vmax.f32 %v379_v28, 0.0  ;;  %v431_v34 = vmax.f32 %v422_v29, 0.0  ;;  %v2084_v28 = vld [vmem:[#allocation7 + $0x60] sm:$0xff]  }
 0x1c2   :  { %v383_v32 = vpop.f32.mrb[2].mxu0  ;;  %v425_v33 = vpop.f32.mrb[2].mxu1  ;;  %v430_v39 = vmax.f32 %v381_v30, 0.0  ;;  %v2085_v29 = vld [vmem:[#allocation7 + $0xe0] sm:$0xff]  }
 0x1c3   :  { %v432_v35 = vmax.f32 %v383_v32, 0.0  ;;  %v434_v36 = vmax.f32 %v425_v33, 0.0  ;;  %v385_v37 = vpop.f32.mrb[3].mxu0  ;;  %v1840_v38 = vpop.f32.mrb[3].mxu1  ;;  %v2086_v30 = vld [vmem:[#allocation7 + $0x20] sm:$0xff]   ;;  %v2088_v32 = vld [vmem:[#allocation7 + $0x68] sm:$0xff]  }
 0x1c4   :  { %v433_v40 = vmax.f32 %v385_v37, 0.0  ;;  %v2087_v31 = vld [vmem:[#allocation7 + $0xa0] sm:$0xff]   ;;  %v2089_v33 = vld [vmem:[#allocation7 + $0xe8] sm:$0xff]   ;;  %v2094_v37 = vld [vmem:[#allocation7 + $0x30] sm:$0xff]  }
 0x1c5   :  { %v435_v41 = vpack.c.bf16 %v432_v35, %v429_v2  ;;  %v2349_v42 = vpack.c.bf16 %v434_v36, %v431_v34  ;;  %v2090_v2 = vld [vmem:[#allocation7 + $0x28] sm:$0xff]   ;;  %v2092_v35 = vld [vmem:[#allocation7 + $0x70] sm:$0xff]  }
 0x1c6   :  { %v436_v44 = vpack.c.bf16 %v433_v40, %v430_v39  ;;  %v2091_v34 = vld [vmem:[#allocation7 + $0xa8] sm:$0xff]   ;;  %v2093_v36 = vld [vmem:[#allocation7 + $0xf0] sm:$0xff]   ;;  %v2096_v39 = vld [vmem:[#allocation7 + $0x78] sm:$0xff]  }
 0x1c7   :  { %v2095_v38 = vld [vmem:[#allocation7 + $0xb0] sm:$0xff]   ;;  %v2097_v40 = vld [vmem:[#allocation7 + $0xf8] sm:$0xff]  }
 0x1c8   :  { %1068 = vmatprep.mubr.bf16.mxu0 %v436_v44  ;;  %1154 = vmatprep.mubr.bf16.mxu1 %v436_v44  ;;  %v537_v44 = vshrl.u32 %v68_v43, 7 }
 0x1c9   :  { %1069 = vmatmul.mubr.bf16.vlgmr.msra.gmra.mrb[4].mxu0 %v435_v41  ;;  %1155 = vmatmul.mubr.bf16.vlgmr.msra.gmra.mrb[4].mxu1 %v435_v41  ;;  %v2098_v41 = vld [vmem:[#allocation7 + $0x38] sm:$0xff]  }
 0x1ca   :  { %1080 = vmatpush1.bf16.msra.mxu0 %v2020_v45  ;;  %1166 = vmatpush1.bf16.msra.mxu1 %v2023_v46  ;;  %v538_v45 = vsub.s32 0, %v537_v44  ;;  %v546_v46 = vsub.s32 2, %v537_v44 }
 0x1cb   :  { %1081 = vmatprep.subr.bf16.mxu0 %v2028_v47  ;;  %1167 = vmatprep.subr.bf16.mxu1 %v2031_v48  ;;  %v534_v47 = vld [vmem:[%s2377_s3] sm:$0xf]  ;;  %v542_v48 = vsub.s32 1, %v537_v44 }
 0x1cc   :  { %1111 = vmatprep.mubr.bf16.mxu0 %v2212_v1  ;;  %1197 = vmatprep.mubr.bf16.mxu1 %v2212_v1  ;;  %v2047_v1 = vld [vmem:[#allocation5 + $0x288] ss:$16 sps:$4 sm:$0xff]  }
 0x1ce   :  { %1082 = vmatpush1.bf16.msra.mxu0 %v2026_v49  ;;  %1168 = vmatpush1.bf16.msra.mxu1 %v2029_v50  ;;  %v550_v49 = vsub.s32 3, %v537_v44  ;;  %v539_v50 = vrot.slane %v534_v47, %v538_v45 }
 0x1cf   :  { %1083 = vmatprep.subr.bf16.mxu0 %v2034_v51  ;;  %1169 = vmatprep.subr.bf16.mxu1 %v2037_v52  ;;  %v547_v51 = vrot.slane %v534_v47, %v546_v46  ;;  %v543_v52 = vrot.slane %v534_v47, %v542_v48 }
 0x1d2   :  { %1084 = vmatpush1.bf16.msra.mxu0 %v2032_v53  ;;  %1170 = vmatpush1.bf16.msra.mxu1 %v2035_v54  ;;  %v551_v53 = vrot.slane %v534_v47, %v550_v49 }
 0x1d3   :  { %1085 = vmatprep.subr.bf16.mxu0 %v2040_v55  ;;  %1171 = vmatprep.subr.bf16.mxu1 %v2043_v56 }
 0x1d6   :  { %1086 = vmatpush1.bf16.msra.mxu0 %v2038_v57  ;;  %1172 = vmatpush1.bf16.msra.mxu1 %v2041_v58 }
 0x1d7   :  { %1087 = vmatprep.subr.bf16.mxu0 %v2046_v59  ;;  %1173 = vmatprep.subr.bf16.mxu1 %v2049_v60 }
 0x1da   :  { %1088 = vmatpush1.bf16.msra.mxu0 %v2044_v61  ;;  %1174 = vmatpush1.bf16.msra.mxu1 %v2047_v1 }
 0x1db   :  { %1089 = vmatprep.subr.bf16.mxu0 %v2052_v62  ;;  %1175 = vmatprep.subr.bf16.mxu1 %v2055_v63 }
 0x1de   :  { %1090 = vmatpush1.bf16.msra.mxu0 %v2050_v0  ;;  %1176 = vmatpush1.bf16.msra.mxu1 %v2053_v3 }
 0x1df   :  { %1091 = vmatprep.subr.bf16.mxu0 %v2058_v4  ;;  %1177 = vmatprep.subr.bf16.mxu1 %v2061_v5 }
 0x1e2   :  { %1092 = vmatpush1.bf16.msra.mxu0 %v2056_v6  ;;  %1178 = vmatpush1.bf16.msra.mxu1 %v2059_v7 }
 0x1e3   :  { %1093 = vmatprep.subr.bf16.mxu0 %v2064_v8  ;;  %1179 = vmatprep.subr.bf16.mxu1 %v2067_v9 }
 0x1e6   :  { %1094 = vmatpush1.bf16.msra.mxu0 %v2062_v10  ;;  %1180 = vmatpush1.bf16.msra.mxu1 %v2065_v11 }
 0x1e7   :  { %1777 = vmatprep.subr.bf16.mxu0 %v2068_v12  ;;  %1799 = vmatprep.subr.bf16.mxu1 %v2069_v13 }
 0x1e9   :  { %1112 = vmatmul.mubr.bf16.vlgmr.msra.gmra.mrb[4].mxu0 %v2349_v42  ;;  %1198 = vmatmul.mubr.bf16.vlgmr.msra.gmra.mrb[4].mxu1 %v2349_v42  ;;  %v2099_v42 = vld [vmem:[#allocation7 + $0xb8] sm:$0xff]  }
 0x1ea   :  { %1778 = vmatpush3.bf16.msra.mxu0 %v2070_v14  ;;  %1800 = vmatpush3.bf16.msra.mxu1 %v2071_v15 }
 0x1eb   :  { %1779 = vmatprep.subr.bf16.mxu0 %v2072_v16  ;;  %1801 = vmatprep.subr.bf16.mxu1 %v2073_v17 }
 0x1ee   :  { %1780 = vmatpush3.bf16.msra.mxu0 %v2074_v18  ;;  %1802 = vmatpush3.bf16.msra.mxu1 %v2075_v19 }
 0x1ef   :  { %1781 = vmatprep.subr.bf16.mxu0 %v2076_v20  ;;  %1803 = vmatprep.subr.bf16.mxu1 %v2077_v21  ;;  %v1733_v20 = vld [vmem:[%s2379_s5] ss:$0 sm:$0xff]  ;;  %s2221_s5 = smov [#allocation8]  }
 0x1f0   :  { %s1584_s18 = sshll.u32 %s2221_s5, 4  ;;  %s1585_s18 = int_to_ptr.vmem [resolvable:$true] %s1584_s18 }
 0x1f1   :  { %s2174_s19 = scalar_lea.vmem %s1585_s18, 256  ;;  %p2179_p11 = scmp.lt.s32.totalorder %s1585_s18, %s1585_s18 }
 0x1f2   :  { %1782 = vmatpush3.bf16.msra.mxu0 %v2078_v22  ;;  %1804 = vmatpush3.bf16.msra.mxu1 %v2079_v23  ;;  %p2175_p10 = scmp.ne.s32.totalorder %s1585_s18, %s2174_s19  ;;  %p2180_p12 = scmp.lt.s32.totalorder %s2174_s19, %s2174_s19 }
 0x1f3   :  { %1783 = vmatprep.subr.bf16.mxu0 %v2080_v24  ;;  %1805 = vmatprep.subr.bf16.mxu1 %v2081_v25 }
 0x1f4   :  { %p2181_p13 = por %p2180_p12, %p2179_p11 }
 0x1f6   :  { %1784 = vmatpush3.bf16.msra.mxu0 %v2082_v26  ;;  %1806 = vmatpush3.bf16.msra.mxu1 %v2083_v27  ;;  %p2182_p0 = pnand %p2181_p13, %p2175_p10 }
 0x1f7   :  { %1785 = vmatprep.subr.bf16.mxu0 %v2084_v28  ;;  %1807 = vmatprep.subr.bf16.mxu1 %v2085_v29 }
 0x1fa   :  { %1786 = vmatpush3.bf16.msra.mxu0 %v2086_v30  ;;  %1808 = vmatpush3.bf16.msra.mxu1 %v2087_v31 }
 0x1fb   :  { %1787 = vmatprep.subr.bf16.mxu0 %v2088_v32  ;;  %1809 = vmatprep.subr.bf16.mxu1 %v2089_v33 }
 0x1fe   :  { %1788 = vmatpush3.bf16.msra.mxu0 %v2090_v2  ;;  %1810 = vmatpush3.bf16.msra.mxu1 %v2091_v34 }
 0x1ff   :  { %1789 = vmatprep.subr.bf16.mxu0 %v2092_v35  ;;  %1811 = vmatprep.subr.bf16.mxu1 %v2093_v36 }
 0x202   :  { %1790 = vmatpush3.bf16.msra.mxu0 %v2094_v37  ;;  %1812 = vmatpush3.bf16.msra.mxu1 %v2095_v38 }
 0x203   :  { %1791 = vmatprep.subr.bf16.mxu0 %v2096_v39  ;;  %1813 = vmatprep.subr.bf16.mxu1 %v2097_v40 }
 0x206   :  { %1792 = vmatpush3.bf16.msra.mxu0 %v2098_v41  ;;  %1814 = vmatpush3.bf16.msra.mxu1 %v2099_v42 }
 0x2bc   :  { %v1113_v54 = vpop.f32.mrb[4].mxu0  ;;  %v1199_v55 = vpop.f32.mrb[4].mxu1 }
 0x2bd   :  { %v1841_v56 = vadd.f32 %v1113_v54, %v539_v50  ;;  %v1845_v57 = vadd.f32 %v1199_v55, %v547_v51  ;;  %v1115_v58 = vpop.f32.mrb[5].mxu0  ;;  %v1201_v59 = vpop.f32.mrb[5].mxu1 }
 0x2be   :  { %v1842_v60 = vadd.f32 %v1115_v58, %v543_v52  ;;  %v1846_v43 = vadd.f32 %v1201_v59, %v551_v53  ;;  %v1117_v61 = vpop.f32.mrb[6].mxu0  ;;  %v1203_v1 = vpop.f32.mrb[6].mxu1 }
 0x2bf   :  { %v1843_v62 = vadd.f32 %v1117_v61, %v539_v50  ;;  %v1847_v63 = vadd.f32 %v1203_v1, %v547_v51  ;;  %v1119_v0 = vpop.f32.mrb[7].mxu0  ;;  %v1205_v3 = vpop.f32.mrb[7].mxu1  ;;  %v1208_v6 = vmax.f32 %v1841_v56, 0.0  ;;  %v1210_v7 = vmax.f32 %v1845_v57, 0.0 }
 0x2c0   :  { %v1844_v4 = vadd.f32 %v1119_v0, %v543_v52  ;;  %v1848_v5 = vadd.f32 %v1205_v3, %v551_v53  ;;  %v1209_v10 = vmax.f32 %v1842_v60, 0.0  ;;  %v1211_v11 = vmax.f32 %v1846_v43, 0.0 }
 0x2c1   :  { %v1212_v8 = vmax.f32 %v1843_v62, 0.0  ;;  %v1214_v9 = vmax.f32 %v1847_v63, 0.0 }
 0x2c2   :  { %v1213_v12 = vmax.f32 %v1844_v4, 0.0  ;;  %v1215_v13 = vmax.f32 %v1848_v5, 0.0 }
 0x2c3   :  { %v1216_v14 = vpack.c.bf16 %v1212_v8, %v1208_v6  ;;  %v1218_v15 = vpack.c.bf16 %v1214_v9, %v1210_v7 }
 0x2c4   :  { %v1217_v16 = vpack.c.bf16 %v1213_v12, %v1209_v10  ;;  %v1219_v17 = vpack.c.bf16 %v1215_v13, %v1211_v11 }
 0x2c6   :  { %1515 = vmatprep.mubr.bf16.mxu0 %v1217_v16  ;;  %1556 = vmatprep.mubr.bf16.mxu1 %v1219_v17 }
 0x2c7   :  { %1516 = vmatmul.mubr.bf16.vlgmr.msra.gmra.mrb[8].mxu0 %v1216_v14  ;;  %1557 = vmatmul.mubr.bf16.vlgmr.msra.gmra.mrb[8].mxu1 %v1218_v15 }
 0x39a   :  { %v1793_v18 = vpop.f32.mrb[8].mxu0  ;;  %v1815_v19 = vpop.f32.mrb[8].mxu1 }
 0x39b   :  { %v1794_v21 = vpop.f32.mrb[9].mxu0  ;;  %v1816_v22 = vpop.f32.mrb[9].mxu1 }
 0x39c   :  { %v1795_v23 = vadd.f32 %v1794_v21, %v1793_v18  ;;  %v1817_v24 = vadd.f32 %v1816_v22, %v1815_v19  ;;  %v1796_v25 = vpop.f32.mrb[10].mxu0  ;;  %v1818_v26 = vpop.f32.mrb[10].mxu1 }
 0x39d   :  { %v1797_v27 = vpop.f32.mrb[11].mxu0  ;;  %v1819_v28 = vpop.f32.mrb[11].mxu1 }
 0x39e   :  { %v1518_v29 = vadd.f32 %v1795_v23, %v1733_v20  ;;  %v1798_v30 = vadd.f32 %v1797_v27, %v1796_v25  ;;  %v1820_v31 = vadd.f32 %v1819_v28, %v1818_v26 }
 0x3a0   :  { %v1559_v32 = vadd.f32 %v1817_v24, %v1518_v29  ;;  %v1521_v33 = vadd.f32 %v1798_v30, %v1733_v20 }
 0x3a2   :  { %v1766_v2 = vmul.f32 -1.442695, %v1559_v32  ;;  %v1562_v34 = vadd.f32 %v1820_v31, %v1521_v33 }
 0x3a4   :  { %2100 = vpow2.f32 %v1766_v2  ;;  %v1767_v35 = vmul.f32 -1.442695, %v1562_v34 }
 0x3a6   :  { %2102 = vpow2.f32 %v1767_v35 }
 0x3ae   :  { %v2101_v36 = vpop.eup %2100 }
 0x3af   :  { %v1571_v37 = vadd.f32 1.0, %v2101_v36 }
 0x3b0   :  { %v2103_v38 = vpop.eup %2102 }
 0x3b1   :  { %2104 = vrcp.f32 %v1571_v37  ;;  %v1572_v39 = vadd.f32 1.0, %v2103_v38 }
 0x3b3   :  { %2106 = vrcp.f32 %v1572_v39 }
 0x3bb   :  { %v2105_v40 = vpop.eup %2104 }
 0x3bc   :  { %1577 = vst [vmem:[#allocation8] sm:$0xff] %v2105_v40 }
 0x3bd   :  { %v2107_v41 = vpop.eup %2106 }
 0x3be   :  { %1578 = vst [vmem:[#allocation8 + $0x8] sm:$0xff] %v2107_v41 }
 0x3bf   :  { %2185 = shalt.err (!%p2182_p0)
}
 0x3c0   :  { %s2186_s21 = scalar_lea.hbm %s2380_s6, 256 }
 0x3c1   :  { %p2187_p1 = scmp.ne.s32.totalorder %s2380_s6, %s2186_s21  ;;  %p2190_p2 = scmp.lt.u32.totalorder %s2186_s21, %s2380_s6 }
 0x3c3   :  { %p2192_p3 = pnand %p2190_p2, %p2187_p1 }
 0x3c5   :  { %2195 = shalt.err (!%p2192_p3)
}
 0x3c6   :  { %s2222_s26 = smov 128   ;;  %s2223_s27 = smov 8  }
 0x3c7   :  { %1590 = dma.vmem_to_hbm [thread:$0]  %s1585_s18, 256, %s2380_s6, [#allocation4], %s2222_s26, %s2222_s26, %s2223_s27  }
 0x3c8   :  { %2200 = dma.done.wait [#allocation4], 256  }
 0x3c9   :  { %2201 = vsyncadd [#allocation4], 4294967040 }
 0x3ca   :  { %1594 = vsyncpa [#allocation3], 1 }
 0x3cb   :  { %1595 = vsyncpa [#allocation6], 1 }
 0x3cc   :  { %1596 = vsyncpa [#allocation4], 1 }

</bundles_post_ra>
